<compile_context>
chip_gen: v7x
topology: tpu7x:2x2x1
jax: 0.10.0
libtpu: 0.0.40
codegen_flags: <defaults>
</compile_context>

<pallas_src>
import functools

import jax
import jax.numpy as jnp
from jax import lax
from jax.experimental import pallas as pl
from jax.experimental.pallas import tpu as pltpu

Nx = 8
Ny = Nx
N = Nx * Ny          # v_num = 64
H_NUM = 100          # h_num = 100
U = 4.0
T = 0.15

_LANES = 128
_DEFAULT_B_TILE = 8192       # multiple of 1024; ~15 MiB live VMEM -> fits every chip


def _round_up(n, m):
    return ((n + m - 1) // m) * m


def _rbm_kernel(x_ref, w_ref, b_ref, sel_sp_ref, sel_z_ref, o_ref):
    """One batch tile.

    x_ref:      (bt, V)   int8/bf16/f32 visible configurations
    w_ref:      (V, HP)   W^T padded to 128 lanes; column h_num holds U/(2T)
    b_ref:      (1, HP)   bias (0 on the coef lane and on pad lanes)
    sel_sp_ref: (8, HP)   row 0 = 1.0 on true hidden lanes, 0 elsewhere
    sel_z_ref:  (8, HP)   row 0 = 1.0 on the coef lane,     0 elsewhere
    o_ref:      (1, bt)   per-row minus_F, lane-major
    """
    # VPU cast (values are 0/1 occupations -> exact in any float dtype).
    x = x_ref[...].astype(jnp.float32).astype(w_ref.dtype)

    # MXU: (bt, V) @ (V, HP) -> f32.  The coef lane already equals
    # U/(2T) * sum(x) per row.
    z = jnp.dot(x, w_ref[...], preferred_element_type=jnp.float32) + b_ref[...]

    # Numerically stable softplus: 1 exp + 1 log on the EUP, rest on the VPU.
    sp = jnp.maximum(z, 0.0) + jnp.log(1.0 + jnp.exp(-jnp.abs(z)))

    # Hidden-axis reduction on the MXU via selector rows: lane masking and the
    # coef-lane bypass come for free and the result is lane-major -> dense
    # (1, bt) store (no masked vst, contiguous writeback DMA).
    dn = (((1,), (1,)), ((), ()))            # contract the HP axis of both operands
    r = (lax.dot_general(sel_sp_ref[...], sp, dn, preferred_element_type=jnp.float32)
         + lax.dot_general(sel_z_ref[...], z, dn, preferred_element_type=jnp.float32))
    o_ref[...] = r[0:1, :]                   # (1, bt): only row 0 is populated


def prepare_rbm_params(weight, bias, *, u=U, t=T, dot_dtype=jnp.float32):
    """Build padded, kernel-ready operands ONCE per weight update.

    weight: (h_num, v_num) f32, bias: (h_num,) f32.
    Returns (w_pad, b_pad, sel_sp, sel_z) for rbm_forward_prepared().
    """
    h_num, v_num = weight.shape
    hp = _round_up(h_num + 1, _LANES)        # hidden lanes + 1 row-sum (coef) lane
    coef = float(u) / (2.0 * float(t))

    w_pad = jnp.zeros((v_num, hp), dot_dtype)
    w_pad = w_pad.at[:, :h_num].set(weight.T.astype(dot_dtype))
    w_pad = w_pad.at[:, h_num].set(jnp.asarray(coef, dot_dtype))

    b_pad = jnp.zeros((1, hp), jnp.float32)
    b_pad = b_pad.at[0, :h_num].set(bias.astype(jnp.float32))

    lane = jnp.arange(hp)[None, :]
    row = jnp.arange(8)[:, None]
    sel_sp = ((row == 0) & (lane < h_num)).astype(jnp.float32)    # (8, hp)
    sel_z = ((row == 0) & (lane == h_num)).astype(jnp.float32)    # (8, hp)
    return w_pad, b_pad, sel_sp, sel_z


@functools.partial(jax.jit, static_argnames=("b_tile",))
def rbm_forward_prepared(x, w_pad, b_pad, sel_sp, sel_z, *, b_tile=_DEFAULT_B_TILE):
    """x: (B, v_num) int8/bf16/f32 -> (B,) f32 minus_F."""
    B, V = x.shape
    HP = w_pad.shape[1]
    b_tile = _round_up(int(b_tile), 256)

    # Batch tile: big enough to amortise per-step overhead, small enough for
    # v7x's 64 MiB VMEM; prefer >=2 grid steps so both v7x TCs get work.
    if B >= 512:
        bt = min(b_tile, _round_up((B + 1) // 2, 256))
    else:
        bt = _round_up(B, 256)
    Bp = _round_up(B, bt)
    if Bp != B:
        x = jnp.pad(x, ((0, Bp - B), (0, 0)))       # padded rows are sliced off below
    num_tiles = Bp // bt

    x_bytes = Bp * V * jnp.dtype(x.dtype).itemsize
    resident_bytes = (w_pad.size * jnp.dtype(w_pad.dtype).itemsize
                      + (b_pad.size + sel_sp.size + sel_z.size) * 4)
    cost = pl.CostEstimate(
        flops=2 * Bp * HP * (V + 16),               # main dot + 2 selector reduces
        transcendentals=2 * Bp * HP,                # exp + log per hidden lane
        bytes_accessed=x_bytes + Bp * 4 + resident_bytes,
    )

    out = pl.pallas_call(
        _rbm_kernel,
        out_shape=jax.ShapeDtypeStruct((1, Bp), jnp.float32),
        grid=(num_tiles,),
        in_specs=[
            pl.BlockSpec((bt, V), lambda i: (i, 0)),     # streamed batch tiles
            pl.BlockSpec((V, HP), lambda i: (0, 0)),     # resident W^T (+ coef column)
            pl.BlockSpec((1, HP), lambda i: (0, 0)),     # resident bias
            pl.BlockSpec((8, HP), lambda i: (0, 0)),     # resident softplus selector
            pl.BlockSpec((8, HP), lambda i: (0, 0)),     # resident coef-lane selector
        ],
        out_specs=pl.BlockSpec((1, bt), lambda i: (0, i)),   # lane-dense output slab
        compiler_params=pltpu.CompilerParams(
            dimension_semantics=("parallel",),           # batch is embarrassingly parallel
            vmem_limit_bytes=48 * 1024 * 1024,           # headroom for bt=8192 on v7x
        ),
        cost_estimate=cost,
    )(x, w_pad, b_pad, sel_sp, sel_z)
    return out[0, :B]


def rbm_forward(x, weight, bias, *, u=U, t=T, dot_dtype=jnp.float32,
                b_tile=_DEFAULT_B_TILE):
    """Convenience wrapper.  In a Monte-Carlo loop, call prepare_rbm_params()
    once per weight update and reuse the result with rbm_forward_prepared()."""
    params = prepare_rbm_params(weight, bias, u=u, t=t, dot_dtype=dot_dtype)
    return rbm_forward_prepared(x, *params, b_tile=b_tile)


def rbm_reference(x, weight, bias, *, u=U, t=T):
    z = x.astype(jnp.float32) @ weight.T + bias
    minus_f = jnp.log(jnp.exp(z) + 1.0).sum(axis=1)
    minus_f = minus_f + x.astype(jnp.float32).sum(axis=1) * u / (2.0 * t)
    return minus_f


if __name__ == "__main__":
    key = jax.random.PRNGKey(0)
    k_x, k_w, k_b = jax.random.split(key, 3)

    B = 8
    v_num = N        # 64
    h_num = H_NUM    # 100

    # Deterministic synthetic params, matching torch.nn.Linear init ranges
    # (uniform in +/- 1/sqrt(v_num)).
    bound = 1.0 / float(jnp.sqrt(jnp.float32(v_num)))
    weight = jax.random.uniform(k_w, (h_num, v_num), jnp.float32, -bound, bound)
    bias = jax.random.uniform(k_b, (h_num,), jnp.float32, -bound, bound)

    # Visible layer: spin-like 0/1 occupations carried as int8 (exact, 4x less
    # HBM traffic on the dominant stream).
    x_bits = jax.random.bernoulli(k_x, 0.5, (B, v_num))
    x_i8 = x_bits.astype(jnp.int8)

    ref = rbm_reference(x_bits.astype(jnp.float32), weight, bias)

    # Exact f32 path (validation / default).
    params_f32 = prepare_rbm_params(weight, bias)
    out = rbm_forward_prepared(x_i8, *params_f32)
    jax.block_until_ready(out)
    assert out.shape == (B,)
    assert jnp.allclose(out, ref, rtol=1e-5, atol=1e-5), (out, ref)

    # Fast bf16-dot path (single-pass MXU; MC-sampling accuracy).
    params_bf16 = prepare_rbm_params(weight, bias, dot_dtype=jnp.bfloat16)
    out_bf16 = rbm_forward_prepared(x_i8, *params_bf16)
    jax.block_until_ready(out_bf16)
    assert jnp.allclose(out_bf16, ref, rtol=1e-2, atol=1e-2), (out_bf16, ref)

    print("KERNEL_OK")
</pallas_src>

<mosaic_0001>
module attributes {stable_mosaic.version = 11 : i64} {
  func.func @_rbm_kernel(%arg0: i32, %arg1: memref<256x64xi8, #tpu.memory_space<vmem>>, %arg2: memref<64x128xf32, #tpu.memory_space<vmem>>, %arg3: memref<1x128xf32, #tpu.memory_space<vmem>>, %arg4: memref<8x128xf32, #tpu.memory_space<vmem>>, %arg5: memref<8x128xf32, #tpu.memory_space<vmem>>, %arg6: memref<1x256xf32, #tpu.memory_space<vmem>>) attributes {dimension_semantics = [#tpu.dimension_semantics<parallel>], iteration_bounds = array<i64: 1>, scalar_prefetch = 0 : i64, scratch_operands = 0 : i64, tpu.core_type = #tpu.core_type<tc>, window_params = [{transform_indices = @transform_0, window_bounds = array<i64: 256, 64>}, {pipeline_mode = #tpu.pipeline_mode<synchronous>, transform_indices = @transform_1, window_bounds = array<i64: 64, 128>}, {pipeline_mode = #tpu.pipeline_mode<synchronous>, transform_indices = @transform_2, window_bounds = array<i64: 1, 128>}, {pipeline_mode = #tpu.pipeline_mode<synchronous>, transform_indices = @transform_3, window_bounds = array<i64: 8, 128>}, {pipeline_mode = #tpu.pipeline_mode<synchronous>, transform_indices = @transform_4, window_bounds = array<i64: 8, 128>}, {transform_indices = @transform_5, window_bounds = array<i64: 1, 256>}]} {
    %c0 = arith.constant 0 : index
    %c0_0 = arith.constant 0 : index
    %0 = vector.load %arg1[%c0, %c0_0] : memref<256x64xi8, #tpu.memory_space<vmem>>, vector<256x64xi8>
    %1 = arith.sitofp %0 : vector<256x64xi8> to vector<256x64xf32>
    %c0_1 = arith.constant 0 : index
    %c0_2 = arith.constant 0 : index
    %2 = vector.load %arg2[%c0_1, %c0_2] : memref<64x128xf32, #tpu.memory_space<vmem>>, vector<64x128xf32>
    %cst = arith.constant dense<0.000000e+00> : vector<256x128xf32>
    %3 = tpu.matmul %1, %2, %cst {dimension_numbers = #tpu.dot_dimension_numbers<[1], [0], [0], [1], [0, 0, 1, 1], [], []>} : vector<256x64xf32>, vector<64x128xf32>, vector<256x128xf32> -> vector<256x128xf32>
    %c0_3 = arith.constant 0 : index
    %c0_4 = arith.constant 0 : index
    %4 = vector.load %arg3[%c0_3, %c0_4] : memref<1x128xf32, #tpu.memory_space<vmem>>, vector<1x128xf32>
    %5 = vector.broadcast %4 : vector<1x128xf32> to vector<256x128xf32>
    %6 = arith.addf %3, %5 : vector<256x128xf32>
    %cst_5 = arith.constant 0.000000e+00 : f32
    %7 = vector.broadcast %cst_5 : f32 to vector<256x128xf32>
    %8 = arith.maximumf %6, %7 : vector<256x128xf32>
    %9 = math.absf %6 : vector<256x128xf32>
    %cst_6 = arith.constant 0.000000e+00 : f32
    %10 = vector.broadcast %cst_6 : f32 to vector<256x128xf32>
    %11 = arith.subf %10, %9 : vector<256x128xf32>
    %12 = math.exp %11 : vector<256x128xf32>
    %cst_7 = arith.constant 1.000000e+00 : f32
    %13 = vector.broadcast %cst_7 : f32 to vector<256x128xf32>
    %14 = arith.addf %13, %12 : vector<256x128xf32>
    %15 = math.log %14 : vector<256x128xf32>
    %16 = arith.addf %8, %15 : vector<256x128xf32>
    %c0_8 = arith.constant 0 : index
    %c0_9 = arith.constant 0 : index
    %17 = vector.load %arg4[%c0_8, %c0_9] : memref<8x128xf32, #tpu.memory_space<vmem>>, vector<8x128xf32>
    %cst_10 = arith.constant dense<0.000000e+00> : vector<8x256xf32>
    %18 = tpu.matmul %17, %16, %cst_10 {dimension_numbers = #tpu.dot_dimension_numbers<[1], [1], [0], [0], [0, 0, 1, 0], [], []>} : vector<8x128xf32>, vector<256x128xf32>, vector<8x256xf32> -> vector<8x256xf32>
    %c0_11 = arith.constant 0 : index
    %c0_12 = arith.constant 0 : index
    %19 = vector.load %arg5[%c0_11, %c0_12] : memref<8x128xf32, #tpu.memory_space<vmem>>, vector<8x128xf32>
    %cst_13 = arith.constant dense<0.000000e+00> : vector<8x256xf32>
    %20 = tpu.matmul %19, %6, %cst_13 {dimension_numbers = #tpu.dot_dimension_numbers<[1], [1], [0], [0], [0, 0, 1, 0], [], []>} : vector<8x128xf32>, vector<256x128xf32>, vector<8x256xf32> -> vector<8x256xf32>
    %21 = arith.addf %18, %20 : vector<8x256xf32>
    %22 = vector.extract_strided_slice %21 {offsets = [0, 0], sizes = [1, 256], strides = [1, 1]} : vector<8x256xf32> to vector<1x256xf32>
    %c0_14 = arith.constant 0 : index
    %c0_15 = arith.constant 0 : index
    %23 = vector.load %arg6[%c0_14, %c0_15] : memref<1x256xf32, #tpu.memory_space<vmem>>, vector<1x256xf32>
    tpu.vector_store %arg6[%c0_14, %c0_15], %22 {strides = array<i32>} : memref<1x256xf32, #tpu.memory_space<vmem>>, vector<1x256xf32>,
    return
  }
  func.func @transform_0(%arg0: i32) -> (i32, i32) {
    %c0_i32 = arith.constant 0 : i32
    %c0_i32_0 = arith.constant 0 : i32
    return %arg0, %c0_i32 : i32, i32
  }
  func.func @transform_1(%arg0: i32) -> (i32, i32) {
    %c0_i32 = arith.constant 0 : i32
    %c0_i32_0 = arith.constant 0 : i32
    %c0_i32_1 = arith.constant 0 : i32
    return %c0_i32, %c0_i32_0 : i32, i32
  }
  func.func @transform_2(%arg0: i32) -> (i32, i32) {
    %c0_i32 = arith.constant 0 : i32
    %c0_i32_0 = arith.constant 0 : i32
    %c0_i32_1 = arith.constant 0 : i32
    return %c0_i32, %c0_i32_0 : i32, i32
  }
  func.func @transform_3(%arg0: i32) -> (i32, i32) {
    %c0_i32 = arith.constant 0 : i32
    %c0_i32_0 = arith.constant 0 : i32
    %c0_i32_1 = arith.constant 0 : i32
    return %c0_i32, %c0_i32_0 : i32, i32
  }
  func.func @transform_4(%arg0: i32) -> (i32, i32) {
    %c0_i32 = arith.constant 0 : i32
    %c0_i32_0 = arith.constant 0 : i32
    %c0_i32_1 = arith.constant 0 : i32
    return %c0_i32, %c0_i32_0 : i32, i32
  }
  func.func @transform_5(%arg0: i32) -> (i32, i32) {
    %c0_i32 = arith.constant 0 : i32
    %c0_i32_0 = arith.constant 0 : i32
    return %c0_i32, %arg0 : i32, i32
  }
}

</mosaic_0001>

<bundles_post_ra>
// kernel: rbm_forward_prepared.1
= control target key start
LH: loop header
LB: loop body
LE: loop exit
PB: predicated region body
PF: predicated region fallthrough
CT: control target
= control target key end

     0   :  { %vm107_vm0 = vcmask 523264   ;;  %s1845_s1 = inlined_call_operand.vmem [shape: f32[64,128], index: 1, kind: input, shape index: {}]   ;;  %s1846_s0 = inlined_call_operand.vmem [shape: s8[256,64], index: 0, kind: input, shape index: {}]   ;;  %s1847_s2 = inlined_call_operand.vmem [shape: f32[1,128], index: 2, kind: input, shape index: {}]   ;;  %s1848_s4 = inlined_call_operand.vmem [shape: f32[8,128], index: 4, kind: input, shape index: {}]   ;;  %s1849_s3 = inlined_call_operand.vmem [shape: f32[8,128], index: 3, kind: input, shape index: {}]   ;;  %s1850_s5 = inlined_call_operand.vmem [shape: f32[1,256], index: 5, kind: output, shape index: {}]  }
   0x1   :  { %v92_v0 = vld [vmem:[%s1845_s1] sm:$0xff]  ;;  %v93_v1 = vld [vmem:[%s1845_s1 + $0x8] sm:$0xff]  ;;  %v94_v2 = vld [vmem:[%s1845_s1 + $0x10] sm:$0xff] }
   0x2   :  { %v1093_v3 = vpack.c.bf16 %v93_v1, %v92_v0  ;;  %v95_v4 = vld [vmem:[%s1845_s1 + $0x18] sm:$0xff]  ;;  %v96_v6 = vld [vmem:[%s1845_s1 + $0x20] sm:$0xff]  ;;  %v97_v7 = vld [vmem:[%s1845_s1 + $0x28] sm:$0xff] }
   0x3   :  { %v1097_v5 = vpack.c.bf16 %v95_v4, %v94_v2  ;;  %v20_v8 = vld [vmem:[%s1846_s0] sm:$0xff]  ;;  %v1101_v10 = vpack.c.bf16 %v97_v7, %v96_v6  ;;  %v98_v12 = vld [vmem:[%s1845_s1 + $0x30] sm:$0xff]  ;;  %v99_v13 = vld [vmem:[%s1845_s1 + $0x38] sm:$0xff] }
   0x4   :  { %1094 = vmatprep.subr.bf16.mxu0 %v1093_v3  ;;  %v28_v9 = vunpack.c.0.s8 %v20_v8  ;;  %v1105_v14 = vpack.c.bf16 %v99_v13, %v98_v12  ;;  %v29_v15 = vunpack.c.1.s8 %v20_v8  ;;  %v30_v16 = vunpack.c.2.s8 %v20_v8  ;;  %v21_v17 = vld [vmem:[%s1846_s0 + $0x8] sm:$0xff]  ;;  %v22_v26 = vld [vmem:[%s1846_s0 + $0x10] sm:$0xff]  ;;  %v23_v35 = vld [vmem:[%s1846_s0 + $0x18] sm:$0xff] }
   0x5   :  { %1096 = vmatpush3.bf16.msra.mxu0 %v1093_v3  ;;  %v31_v19 = vunpack.c.3.s8 %v20_v8  ;;  %v32_v21 = vunpack.c.0.s8 %v21_v17  ;;  %v33_v23 = vunpack.c.1.s8 %v21_v17  ;;  %v34_v25 = vunpack.c.2.s8 %v21_v17  ;;  %v24_v44 = vld [vmem:[%s1846_s0 + $0x20] sm:$0xff]  ;;  %v25_v53 = vld [vmem:[%s1846_s0 + $0x28] sm:$0xff]  ;;  %v26_v62 = vld [vmem:[%s1846_s0 + $0x30] sm:$0xff] }
   0x6   :  { %1098 = vmatprep.subr.bf16.mxu0 %v1097_v5  ;;  %v60_v11 = vcvt.s32.f32 %v28_v9  ;;  %v61_v18 = vcvt.s32.f32 %v29_v15  ;;  %v62_v20 = vcvt.s32.f32 %v30_v16  ;;  %v35_v28 = vunpack.c.3.s8 %v21_v17  ;;  %v27_v7 = vld [vmem:[%s1846_s0 + $0x38] sm:$0xff] }
   0x7   :  { %v63_v22 = vcvt.s32.f32 %v31_v19  ;;  %v64_v24 = vcvt.s32.f32 %v32_v21  ;;  %v65_v27 = vcvt.s32.f32 %v33_v23  ;;  %v66_v29 = vcvt.s32.f32 %v34_v25 }
   0x8   :  { %1045 = vmatprep.mubr.msk.f32.mxu0 %vm107_vm0, %v60_v11  ;;  %v36_v30 = vunpack.c.0.s8 %v22_v26  ;;  %v67_v31 = vcvt.s32.f32 %v35_v28  ;;  %v37_v32 = vunpack.c.1.s8 %v22_v26  ;;  %v38_v34 = vunpack.c.2.s8 %v22_v26 }
   0x9   :  { %1100 = vmatpush3.bf16.msra.mxu0 %v1097_v5  ;;  %v39_v37 = vunpack.c.3.s8 %v22_v26  ;;  %v40_v39 = vunpack.c.0.s8 %v23_v35  ;;  %v41_v41 = vunpack.c.1.s8 %v23_v35  ;;  %v42_v43 = vunpack.c.2.s8 %v23_v35 }
   0xa   :  { %1102 = vmatprep.subr.bf16.mxu0 %v1101_v10  ;;  %v68_v33 = vcvt.s32.f32 %v36_v30  ;;  %v69_v36 = vcvt.s32.f32 %v37_v32  ;;  %v70_v38 = vcvt.s32.f32 %v38_v34  ;;  %v43_v46 = vunpack.c.3.s8 %v23_v35 }
   0xb   :  { %v71_v40 = vcvt.s32.f32 %v39_v37  ;;  %v72_v42 = vcvt.s32.f32 %v40_v39  ;;  %v73_v45 = vcvt.s32.f32 %v41_v41  ;;  %v74_v47 = vcvt.s32.f32 %v42_v43 }
   0xc   :  { %v44_v48 = vunpack.c.0.s8 %v24_v44  ;;  %v75_v49 = vcvt.s32.f32 %v43_v46  ;;  %v45_v50 = vunpack.c.1.s8 %v24_v44  ;;  %v46_v52 = vunpack.c.2.s8 %v24_v44 }
   0xd   :  { %1104 = vmatpush3.bf16.msra.mxu0 %v1101_v10  ;;  %v47_v55 = vunpack.c.3.s8 %v24_v44  ;;  %v48_v57 = vunpack.c.0.s8 %v25_v53  ;;  %v49_v59 = vunpack.c.1.s8 %v25_v53  ;;  %v50_v61 = vunpack.c.2.s8 %v25_v53 }
   0xe   :  { %1106 = vmatprep.subr.bf16.mxu0 %v1105_v14  ;;  %v76_v51 = vcvt.s32.f32 %v44_v48  ;;  %v77_v54 = vcvt.s32.f32 %v45_v50  ;;  %v78_v56 = vcvt.s32.f32 %v46_v52  ;;  %v51_v0 = vunpack.c.3.s8 %v25_v53 }
   0xf   :  { %v79_v58 = vcvt.s32.f32 %v47_v55  ;;  %v80_v60 = vcvt.s32.f32 %v48_v57  ;;  %v81_v63 = vcvt.s32.f32 %v49_v59  ;;  %v82_v1 = vcvt.s32.f32 %v50_v61 }
  0x10   :  { %v52_v2 = vunpack.c.0.s8 %v26_v62  ;;  %v83_v3 = vcvt.s32.f32 %v51_v0  ;;  %v53_v4 = vunpack.c.1.s8 %v26_v62  ;;  %v54_v6 = vunpack.c.2.s8 %v26_v62 }
  0x11   :  { %1108 = vmatpush3.bf16.msra.mxu0 %v1105_v14  ;;  %v55_v9 = vunpack.c.3.s8 %v26_v62  ;;  %v56_v11 = vunpack.c.0.s8 %v27_v7  ;;  %v57_v13 = vunpack.c.1.s8 %v27_v7  ;;  %v58_v15 = vunpack.c.2.s8 %v27_v7 }
  0x12   :  { %v84_v5 = vcvt.s32.f32 %v52_v2  ;;  %v85_v8 = vcvt.s32.f32 %v53_v4  ;;  %v86_v10 = vcvt.s32.f32 %v54_v6  ;;  %v59_v17 = vunpack.c.3.s8 %v27_v7 }
  0x13   :  { %v87_v12 = vcvt.s32.f32 %v55_v9  ;;  %v88_v14 = vcvt.s32.f32 %v56_v11  ;;  %v89_v16 = vcvt.s32.f32 %v57_v13 }
  0x14   :  { %1046 = vmatmul.mubr.msk.f32.vlgmr.msra.gmra.mrb[0].mxu0 %vm107_vm0, %v61_v18  ;;  %v90_v18 = vcvt.s32.f32 %v58_v15  ;;  %v91_v19 = vcvt.s32.f32 %v59_v17 }
  0x15   :  { %1048 = vmatprep.mubr.msk.f32.mxu0 %vm107_vm0, %v62_v20  ;;  %v1418_v20 = vld [vmem:[%s1847_s2] ss:$0 sm:$0xff] }
  0x18   :  { %1049 = vmatmul.mubr.msk.f32.gmra.mrb[2].mxu0 %vm107_vm0, %v63_v22 }
  0x19   :  { %1051 = vmatprep.mubr.msk.f32.mxu0 %vm107_vm0, %v64_v24 }
  0x1c   :  { %1052 = vmatmul.mubr.msk.f32.gmra.mrb[4].mxu0 %vm107_vm0, %v65_v27 }
  0x1d   :  { %1054 = vmatprep.mubr.msk.f32.mxu0 %vm107_vm0, %v66_v29 }
  0x20   :  { %1055 = vmatmul.mubr.msk.f32.gmra.mrb[6].mxu0 %vm107_vm0, %v67_v31 }
  0x21   :  { %1057 = vmatprep.mubr.msk.f32.mxu0 %vm107_vm0, %v68_v33 }
  0x24   :  { %1058 = vmatmul.mubr.msk.f32.gmra.mrb[8].mxu0 %vm107_vm0, %v69_v36 }
  0x25   :  { %1060 = vmatprep.mubr.msk.f32.mxu0 %vm107_vm0, %v70_v38 }
  0x28   :  { %1061 = vmatmul.mubr.msk.f32.gmra.mrb[10].mxu0 %vm107_vm0, %v71_v40 }
  0x29   :  { %1063 = vmatprep.mubr.msk.f32.mxu0 %vm107_vm0, %v72_v42 }
  0x2c   :  { %1064 = vmatmul.mubr.msk.f32.gmra.mrb[12].mxu0 %vm107_vm0, %v73_v45 }
  0x2d   :  { %1066 = vmatprep.mubr.msk.f32.mxu0 %vm107_vm0, %v74_v47 }
  0x30   :  { %1067 = vmatmul.mubr.msk.f32.gmra.mrb[14].mxu0 %vm107_vm0, %v75_v49 }
  0x31   :  { %1069 = vmatprep.mubr.msk.f32.mxu0 %vm107_vm0, %v76_v51 }
  0x34   :  { %1070 = vmatmul.mubr.msk.f32.gmra.mrb[16].mxu0 %vm107_vm0, %v77_v54 }
  0x35   :  { %1072 = vmatprep.mubr.msk.f32.mxu0 %vm107_vm0, %v78_v56 }
  0x38   :  { %1073 = vmatmul.mubr.msk.f32.gmra.mrb[18].mxu0 %vm107_vm0, %v79_v58 }
  0x39   :  { %1075 = vmatprep.mubr.msk.f32.mxu0 %vm107_vm0, %v80_v60 }
  0x3c   :  { %1076 = vmatmul.mubr.msk.f32.gmra.mrb[20].mxu0 %vm107_vm0, %v81_v63 }
  0x3d   :  { %1078 = vmatprep.mubr.msk.f32.mxu0 %vm107_vm0, %v82_v1 }
  0x40   :  { %1079 = vmatmul.mubr.msk.f32.gmra.mrb[22].mxu0 %vm107_vm0, %v83_v3 }
  0x41   :  { %1081 = vmatprep.mubr.msk.f32.mxu0 %vm107_vm0, %v84_v5 }
  0x44   :  { %1082 = vmatmul.mubr.msk.f32.gmra.mrb[24].mxu0 %vm107_vm0, %v85_v8 }
  0x45   :  { %1084 = vmatprep.mubr.msk.f32.mxu0 %vm107_vm0, %v86_v10 }
  0x48   :  { %1085 = vmatmul.mubr.msk.f32.gmra.mrb[26].mxu0 %vm107_vm0, %v87_v12 }
  0x49   :  { %1087 = vmatprep.mubr.msk.f32.mxu0 %vm107_vm0, %v88_v14 }
  0x4c   :  { %1088 = vmatmul.mubr.msk.f32.gmra.mrb[28].mxu0 %vm107_vm0, %v89_v16 }
  0x4d   :  { %1090 = vmatprep.mubr.msk.f32.mxu0 %vm107_vm0, %v90_v18 }
  0x50   :  { %1091 = vmatmul.mubr.msk.f32.gmra.mrb[30].mxu0 %vm107_vm0, %v91_v19 }
  0xe7   :  { %v1047_v21 = vpop.f32.mrb[0].mxu0 }
  0xe8   :  { %v1421_v22 = vadd.f32 %v1047_v21, %v1418_v20  ;;  %v270_v23 = vpop.f32.mrb[1].mxu0 }
  0xe9   :  { %v1424_v24 = vadd.f32 %v1418_v20, %v270_v23 }
  0xea   :  { %1859 = vst [vmem:[#allocation2_spill] sm:$0xff] %v1421_v22  ;;  %v462_v32 = vand.u32 2147483647, %v1421_v22 }
  0xeb   :  { %1860 = vst [vmem:[#allocation3_spill] sm:$0xff] %v1424_v24  ;;  %v461_v25 = vand.u32 2147483647, %v1424_v24  ;;  %v1111_v26 = vpack.c.bf16 %v1421_v22, %v1424_v24  ;;  %v1050_v27 = vpop.f32.mrb[2].mxu0 }
  0xec   :  { %v1430_v28 = vadd.f32 %v1050_v27, %v1418_v20  ;;  %v280_v29 = vpop.f32.mrb[3].mxu0  ;;  %v494_v43 = vsub.f32 0.0, %v462_v32 }
  0xed   :  { %v493_v30 = vsub.f32 0.0, %v461_v25  ;;  %v1433_v31 = vadd.f32 %v1418_v20, %v280_v29 }
  0xee   :  { %v464_v33 = vand.u32 2147483647, %v1430_v28  ;;  %v527_v55 = vmul.f32 1.442695, %v494_v43 }
  0xef   :  { %v525_v34 = vmul.f32 1.442695, %v493_v30  ;;  %v463_v35 = vand.u32 2147483647, %v1433_v31  ;;  %v1115_v36 = vpack.c.bf16 %v1430_v28, %v1433_v31  ;;  %v1053_v37 = vpop.f32.mrb[4].mxu0 }
  0xf0   :  { %v496_v38 = vsub.f32 0.0, %v464_v33  ;;  %v1441_v39 = vadd.f32 %v1053_v37, %v1418_v20  ;;  %v290_v40 = vpop.f32.mrb[5].mxu0 }
  0xf1   :  { %1176 = vpow2.f32 %v525_v34  ;;  %v495_v41 = vsub.f32 0.0, %v463_v35  ;;  %v1444_v42 = vadd.f32 %v1418_v20, %v290_v40 }
  0xf2   :  { %v531_v44 = vmul.f32 1.442695, %v496_v38  ;;  %v466_v45 = vand.u32 2147483647, %v1441_v39 }
  0xf3   :  { %v529_v46 = vmul.f32 1.442695, %v495_v41  ;;  %v465_v47 = vand.u32 2147483647, %v1444_v42  ;;  %v1119_v48 = vpack.c.bf16 %v1441_v39, %v1444_v42  ;;  %v1056_v49 = vpop.f32.mrb[6].mxu0 }
  0xf4   :  { %1178 = vpow2.f32 %v531_v44  ;;  %v498_v50 = vsub.f32 0.0, %v466_v45  ;;  %v1451_v51 = vadd.f32 %v1056_v49, %v1418_v20  ;;  %v300_v52 = vpop.f32.mrb[7].mxu0  ;;  %v1499_v49 = vld [vmem:[%s1849_s3] sm:$0xff] }
  0xf5   :  { %1180 = vpow2.f32 %v529_v46  ;;  %v497_v53 = vsub.f32 0.0, %v465_v47  ;;  %v1454_v54 = vadd.f32 %v1418_v20, %v300_v52  ;;  %v1494_v47 = vld [vmem:[%s1848_s4] sm:$0xff]  ;;  %1862 = vst [vmem:[#allocation5_spill] sm:$0xff] %v1499_v49  ;;  %1027 = vmatprep.mubr.f32.mxu1 %v1499_v49 }
  0xf6   :  { %v535_v56 = vmul.f32 1.442695, %v498_v50  ;;  %v468_v57 = vand.u32 2147483647, %v1451_v51  ;;  %1861 = vst [vmem:[#allocation4_spill] sm:$0xff] %v1494_v47  ;;  %993 = vmatprep.mubr.f32.mxu0 %v1494_v47 }
  0xf7   :  { %v533_v58 = vmul.f32 1.442695, %v497_v53  ;;  %v467_v59 = vand.u32 2147483647, %v1454_v54  ;;  %v1059_v61 = vpop.f32.mrb[8].mxu0 }
  0xf8   :  { %1182 = vpow2.f32 %v535_v56  ;;  %v500_v62 = vsub.f32 0.0, %v468_v57  ;;  %v1461_v63 = vadd.f32 %v1059_v61, %v1418_v20  ;;  %v310_v0 = vpop.f32.mrb[9].mxu0 }
  0xf9   :  { %1184 = vpow2.f32 %v533_v58  ;;  %v499_v1 = vsub.f32 0.0, %v467_v59  ;;  %v1464_v2 = vadd.f32 %v1418_v20, %v310_v0 }
  0xfa   :  { %1186 = vpow2.f32 %v527_v55  ;;  %v539_v3 = vmul.f32 1.442695, %v500_v62  ;;  %v470_v4 = vand.u32 2147483647, %v1461_v63 }
  0xfb   :  { %v1177_v5 = vpop.eup %1176  ;;  %v537_v6 = vmul.f32 1.442695, %v499_v1  ;;  %v469_v7 = vand.u32 2147483647, %v1464_v2  ;;  %v1062_v9 = vpop.f32.mrb[10].mxu0 }
  0xfc   :  { %1188 = vpow2.f32 %v539_v3  ;;  %v502_v10 = vsub.f32 0.0, %v470_v4  ;;  %v1471_v11 = vadd.f32 %v1062_v9, %v1418_v20  ;;  %v320_v12 = vpop.f32.mrb[11].mxu0  ;;  %v589_v19 = vadd.f32 1.0, %v1177_v5 }
  0xfd   :  { %v501_v14 = vsub.f32 0.0, %v469_v7  ;;  %v1475_v15 = vadd.f32 %v1418_v20, %v320_v12  ;;  %1190 = vpow2.f32 %v537_v6 }
  0xfe   :  { %v1179_v16 = vpop.eup %1178  ;;  %v543_v17 = vmul.f32 1.442695, %v502_v10  ;;  %v472_v18 = vand.u32 2147483647, %v1471_v11 }
  0xff   :  { %v1181_v21 = vpop.eup %1180  ;;  %v541_v27 = vmul.f32 1.442695, %v501_v14  ;;  %v471_v29 = vand.u32 2147483647, %v1475_v15  ;;  %v1065_v34 = vpop.f32.mrb[12].mxu0  ;;  %v592_v35 = vadd.f32 1.0, %v1179_v16 }
 0x100   :  { %1192 = vpow2.f32 %v543_v17  ;;  %v504_v32 = vsub.f32 0.0, %v472_v18  ;;  %v1486_v40 = vadd.f32 %v1065_v34, %v1418_v20  ;;  %v330_v41 = vpop.f32.mrb[13].mxu0  ;;  %v591_v44 = vadd.f32 1.0, %v1181_v21 }
 0x101   :  { %v503_v38 = vsub.f32 0.0, %v471_v29  ;;  %v1489_v46 = vadd.f32 %v1418_v20, %v330_v41  ;;  %1194 = vlog2.f32 %v589_v19 }
 0x102   :  { %v1183_v43 = vpop.eup %1182  ;;  %v547_v45 = vmul.f32 1.442695, %v504_v32  ;;  %1196 = vpow2.f32 %v541_v27  ;;  %v474_v61 = vand.u32 2147483647, %v1486_v40 }
 0x103   :  { %v1185_v50 = vpop.eup %1184  ;;  %v545_v55 = vmul.f32 1.442695, %v503_v38  ;;  %v1068_v56 = vpop.f32.mrb[14].mxu0  ;;  %v594_v58 = vadd.f32 1.0, %v1183_v43  ;;  %v473_v0 = vand.u32 2147483647, %v1489_v46 }
 0x104   :  { %v1187_v57 = vpop.eup %1186  ;;  %1198 = vpow2.f32 %v547_v45  ;;  %v340_v62 = vpop.f32.mrb[15].mxu0  ;;  %v1511_v3 = vadd.f32 %v1068_v56, %v1418_v20  ;;  %v593_v5 = vadd.f32 1.0, %v1185_v50  ;;  %v506_v6 = vsub.f32 0.0, %v474_v61 }
 0x105   :  { %1200 = vlog2.f32 %v592_v35  ;;  %v1514_v7 = vadd.f32 %v1418_v20, %v340_v62  ;;  %v505_v10 = vsub.f32 0.0, %v473_v0  ;;  %v1517_v14 = vadd.f32 1.0, %v1187_v57 }
 0x106   :  { %1863 = vst [vmem:[#allocation6_spill] sm:$0xff] %v1511_v3  ;;  %v1189_v4 = vpop.eup %1188  ;;  %1202 = vlog2.f32 %v591_v44  ;;  %v551_v18 = vmul.f32 1.442695, %v506_v6  ;;  %v476_v19 = vand.u32 2147483647, %v1511_v3 }
 0x107   :  { %1204 = vpow2.f32 %v545_v55  ;;  %v1071_v12 = vpop.f32.mrb[16].mxu0  ;;  %v1191_v16 = vpop.eup %1190  ;;  %v596_v21 = vadd.f32 1.0, %v1189_v4  ;;  %v549_v27 = vmul.f32 1.442695, %v505_v10  ;;  %v475_v29 = vand.u32 2147483647, %v1514_v7 }
 0x108   :  { %1206 = vlog2.f32 %v594_v58  ;;  %v350_v34 = vpop.f32.mrb[17].mxu0  ;;  %v508_v38 = vsub.f32 0.0, %v476_v19  ;;  %v1525_v41 = vadd.f32 %v1071_v12, %v1418_v20  ;;  %v595_v44 = vadd.f32 1.0, %v1191_v16 }
 0x109   :  { %1208 = vlog2.f32 %v593_v5  ;;  %v1528_v43 = vadd.f32 %v1418_v20, %v350_v34  ;;  %v507_v50 = vsub.f32 0.0, %v475_v29 }
 0x10a   :  { %v1193_v35 = vpop.eup %1192  ;;  %1864 = vst [vmem:[#allocation7_spill] sm:$0xff] %v1525_v41  ;;  %1210 = vpow2.f32 %v551_v18  ;;  %v555_v57 = vmul.f32 1.442695, %v508_v38  ;;  %v478_v58 = vand.u32 2147483647, %v1525_v41 }
 0x10b   :  { %1865 = vst [vmem:[#allocation8_spill] sm:$0xff] %v1528_v43  ;;  %v598_v45 = vadd.f32 1.0, %v1193_v35  ;;  %v1074_v55 = vpop.f32.mrb[18].mxu0  ;;  %v1530_v56 = vpop.eup %1194  ;;  %1212 = vpow2.f32 %v549_v27  ;;  %v477_v61 = vand.u32 2147483647, %v1528_v43  ;;  %v1109_v6 = vpack.c.bf16 %v1525_v41, %v1528_v43 }
 0x10c   :  { %v1197_v62 = vpop.eup %1196  ;;  %1214 = vlog2.f32 %v596_v21  ;;  %v553_v0 = vmul.f32 1.442695, %v507_v50  ;;  %v1535_v4 = vadd.f32 %v1074_v55, %v1418_v20  ;;  %v360_v5 = vpop.f32.mrb[19].mxu0  ;;  %v510_v16 = vsub.f32 0.0, %v478_v58 }
 0x10d   :  { %v597_v12 = vadd.f32 1.0, %v1197_v62  ;;  %1216 = vpow2.f32 %v555_v57  ;;  %v509_v18 = vsub.f32 0.0, %v477_v61  ;;  %1110 = vmatprep.subr.bf16.mxu0 %v1109_v6  ;;  %v1547_v55 = vadd.f32 %v1418_v20, %v360_v5 }
 0x10e   :  { %v1199_v10 = vpop.eup %1198  ;;  %1218 = vlog2.f32 %v595_v44  ;;  %v480_v21 = vand.u32 2147483647, %v1535_v4  ;;  %v559_v50 = vmul.f32 1.442695, %v510_v16  ;;  %1112 = vmatpush3.bf16.xpose.msra.mxu0 %v1111_v26 }
 0x10f   :  { %v1539_v19 = vpop.eup %1200  ;;  %v600_v27 = vadd.f32 1.0, %v1199_v10  ;;  %v1077_v34 = vpop.f32.mrb[20].mxu0  ;;  %1220 = vlog2.f32 %v598_v45  ;;  %v557_v6 = vmul.f32 1.442695, %v509_v18  ;;  %v479_v10 = vand.u32 2147483647, %v1547_v55 }
 0x110   :  { %v1543_v35 = vpop.eup %1202  ;;  %v370_v44 = vpop.f32.mrb[21].mxu0  ;;  %1222 = vpow2.f32 %v553_v0  ;;  %v512_v58 = vsub.f32 0.0, %v480_v21  ;;  %v1553_v61 = vadd.f32 %v1077_v34, %v1418_v20 }
 0x111   :  { %v1205_v57 = vpop.eup %1204  ;;  %v1556_v62 = vadd.f32 %v1418_v20, %v370_v44  ;;  %1224 = vlog2.f32 %v597_v12  ;;  %v511_v44 = vsub.f32 0.0, %v479_v10 }
 0x112   :  { %v1558_v45 = vpop.eup %1206  ;;  %1226 = vlog2.f32 %v600_v27  ;;  %v563_v16 = vmul.f32 1.442695, %v512_v58  ;;  %v482_v0 = vand.u32 2147483647, %v1553_v61  ;;  %v599_v32 = vadd.f32 1.0, %v1205_v57 }
 0x113   :  { %v1080_v21 = vpop.f32.mrb[22].mxu0  ;;  %v1564_v34 = vpop.eup %1208  ;;  %1228 = vpow2.f32 %v559_v50  ;;  %v481_v1 = vand.u32 2147483647, %v1556_v62  ;;  %v561_v38 = vmul.f32 1.442695, %v511_v44  ;;  %v1113_v50 = vpack.c.bf16 %v1535_v4, %v1547_v55 }
 0x114   :  { %v380_v12 = vpop.f32.mrb[23].mxu0  ;;  %v1211_v29 = vpop.eup %1210  ;;  %1230 = vpow2.f32 %v563_v16  ;;  %v514_v18 = vsub.f32 0.0, %v482_v0  ;;  %v1568_v5 = vadd.f32 %v1080_v21, %v1418_v20  ;;  %v1579_v0 = vmul.f32 0.6931472, %v1530_v56 }
 0x115   :  { %v1571_v27 = vadd.f32 %v1418_v20, %v380_v12  ;;  %v1213_v58 = vpop.eup %1212  ;;  %v602_v26 = vadd.f32 1.0, %v1211_v29  ;;  %v513_v9 = vsub.f32 0.0, %v481_v1  ;;  %1232 = vpow2.f32 %v557_v6  ;;  %1114 = vmatprep.subr.bf16.mxu0 %v1113_v50 }
 0x116   :  { %v1575_v57 = vpop.eup %1214  ;;  %v601_v10 = vadd.f32 1.0, %v1213_v58  ;;  %v484_v16 = vand.u32 2147483647, %v1568_v5  ;;  %1866 = vst [vmem:[#allocation9_spill] sm:$0xff] %v1579_v0  ;;  %1234 = vlog2.f32 %v599_v32  ;;  %v567_v17 = vmul.f32 1.442695, %v514_v18  ;;  %1116 = vmatpush3.bf16.xpose.msra.mxu0 %v1115_v36 }
 0x117   :  { %v1217_v21 = vpop.eup %1216  ;;  %v483_v29 = vand.u32 2147483647, %v1571_v27  ;;  %v1083_v1 = vpop.f32.mrb[24].mxu0  ;;  %1236 = vlog2.f32 %v602_v26  ;;  %v565_v18 = vmul.f32 1.442695, %v513_v9 }
 0x118   :  { %v1583_v44 = vpop.eup %1218  ;;  %v604_v33 = vadd.f32 1.0, %v1217_v21  ;;  %v516_v58 = vsub.f32 0.0, %v484_v16  ;;  %v1589_v56 = vadd.f32 %v1083_v1, %v1418_v20  ;;  %v390_v32 = vpop.f32.mrb[25].mxu0  ;;  %1238 = vpow2.f32 %v561_v38 }
 0x119   :  { %v1591_v6 = vpop.eup %1220  ;;  %v515_v53 = vsub.f32 0.0, %v483_v29  ;;  %v1594_v50 = vadd.f32 %v1418_v20, %v390_v32  ;;  %1240 = vlog2.f32 %v601_v10  ;;  %v1121_v1 = vpack.c.bf16 %v1568_v5, %v1571_v27 }
 0x11a   :  { %v1223_v59 = vpop.eup %1222  ;;  %v571_v16 = vmul.f32 1.442695, %v516_v58  ;;  %v486_v21 = vand.u32 2147483647, %v1589_v56  ;;  %1242 = vlog2.f32 %v604_v33 }
 0x11b   :  { %v1086_v36 = vpop.f32.mrb[26].mxu0  ;;  %v1598_v37 = vpop.eup %1224  ;;  %v569_v52 = vmul.f32 1.442695, %v515_v53  ;;  %v485_v9 = vand.u32 2147483647, %v1594_v50  ;;  %1244 = vpow2.f32 %v567_v17  ;;  %v1117_v53 = vpack.c.bf16 %v1553_v61, %v1556_v62 }
 0x11c   :  { %v400_v38 = vpop.f32.mrb[27].mxu0  ;;  %v1602_v29 = vpop.eup %1226  ;;  %v518_v32 = vsub.f32 0.0, %v486_v21  ;;  %v1605_v10 = vadd.f32 %v1086_v36, %v1418_v20  ;;  %1246 = vpow2.f32 %v565_v18 }
 0x11d   :  { %v1608_v58 = vadd.f32 %v1418_v20, %v400_v38  ;;  %v1610_v26 = vpop.eup %1228  ;;  %v517_v33 = vsub.f32 0.0, %v485_v9  ;;  %1248 = vpow2.f32 %v571_v16  ;;  %1118 = vmatprep.subr.bf16.mxu0 %v1117_v53 }
 0x11e   :  { %v1231_v25 = vpop.eup %1230  ;;  %v575_v21 = vmul.f32 1.442695, %v518_v32  ;;  %v488_v36 = vand.u32 2147483647, %v1605_v10  ;;  %1250 = vpow2.f32 %v569_v52  ;;  %1120 = vmatpush3.bf16.xpose.msra.mxu0 %v1119_v48 }
 0x11f   :  { %v1089_v8 = vpop.f32.mrb[28].mxu0  ;;  %v608_v38 = vadd.f32 1.0, %v1231_v25  ;;  %v573_v18 = vmul.f32 1.442695, %v517_v33  ;;  %v1233_v13 = vpop.eup %1232  ;;  %v487_v23 = vand.u32 2147483647, %v1608_v58  ;;  %1122 = vmatprep.subr.bf16.mxu0 %v1121_v1  ;;  %v1125_v33 = vpack.c.bf16 %v1589_v56, %v1594_v50 }
 0x120   :  { %v410_v9 = vpop.f32.mrb[29].mxu0  ;;  %1252 = vpow2.f32 %v575_v21  ;;  %v520_v12 = vsub.f32 0.0, %v488_v36  ;;  %v1624_v16 = vadd.f32 %v1089_v8, %v1418_v20  ;;  %v1626_v32 = vpop.eup %1234  ;;  %v603_v25 = vadd.f32 1.0, %v1223_v59 }
 0x121   :  { %1254 = vlog2.f32 %v608_v38  ;;  %v1629_v52 = vadd.f32 %v1418_v20, %v410_v9  ;;  %v1633_v53 = vpop.eup %1236  ;;  %v519_v36 = vsub.f32 0.0, %v487_v23  ;;  %v605_v24 = vadd.f32 1.0, %v1233_v13 }
 0x122   :  { %1256 = vpow2.f32 %v573_v18  ;;  %v579_v48 = vmul.f32 1.442695, %v520_v12  ;;  %v1239_v30 = vpop.eup %1238  ;;  %v490_v59 = vand.u32 2147483647, %v1624_v16  ;;  %v628_v13 = vmul.f32 0.6931472, %v1539_v19 }
 0x123   :  { %v1092_v8 = vpop.f32.mrb[30].mxu0  ;;  %v489_v38 = vand.u32 2147483647, %v1629_v52  ;;  %v1642_v60 = vpop.eup %1240  ;;  %v607_v49 = vadd.f32 1.0, %v1239_v30  ;;  %v577_v21 = vmul.f32 1.442695, %v519_v36 }
 0x124   :  { %v1640_v1 = vadd.f32 %v1092_v8, %v1418_v20  ;;  %v420_v9 = vpop.f32.mrb[31].mxu0  ;;  %1258 = vpow2.f32 %v579_v48  ;;  %v1647_v23 = vpop.eup %1242  ;;  %v522_v18 = vsub.f32 0.0, %v490_v59 }
 0x125   :  { %v1645_v12 = vadd.f32 %v1418_v20, %v420_v9  ;;  %1260 = vlog2.f32 %v603_v25  ;;  %v521_v17 = vsub.f32 0.0, %v489_v38  ;;  %v1245_v0 = vpop.eup %1244 }
 0x126   :  { %v492_v47 = vand.u32 2147483647, %v1640_v1  ;;  %1262 = vlog2.f32 %v607_v49  ;;  %v1247_v48 = vpop.eup %1246  ;;  %v610_v36 = vadd.f32 1.0, %v1245_v0  ;;  %v583_v9 = vmul.f32 1.442695, %v522_v18 }
 0x127   :  { %v491_v30 = vand.u32 2147483647, %v1645_v12  ;;  %1264 = vpow2.f32 %v577_v21  ;;  %v1249_v41 = vpop.eup %1248  ;;  %v609_v25 = vadd.f32 1.0, %v1247_v48  ;;  %v581_v59 = vmul.f32 1.442695, %v521_v17 }
 0x128   :  { %v524_v38 = vsub.f32 0.0, %v492_v47  ;;  %v1867_v49 = vpack.c.bf16 %v1451_v51, %v1454_v54  ;;  %v1251_v8 = vpop.eup %1250  ;;  %1266 = vlog2.f32 %v610_v36  ;;  %v612_v22 = vadd.f32 1.0, %v1249_v41 }
 0x129   :  { %v523_v43 = vsub.f32 0.0, %v491_v30  ;;  %v606_v0 = vadd.f32 1.0, %v1610_v26  ;;  %1268 = vlog2.f32 %v609_v25  ;;  %v611_v21 = vadd.f32 1.0, %v1251_v8 }
 0x12a   :  { %1124 = vmatpush3.bf16.xpose.msra.mxu0 %v1867_v49  ;;  %v1253_v3 = vpop.eup %1252  ;;  %v587_v18 = vmul.f32 1.442695, %v524_v38  ;;  %1270 = vlog2.f32 %v612_v22  ;;  %v1129_v17 = vpack.c.bf16 %v1605_v10, %v1608_v58  ;;  %v626_v30 = vmul.f32 0.6931472, %v1543_v35 }
 0x12b   :  { %1126 = vmatprep.subr.bf16.mxu0 %v1125_v33  ;;  %v585_v20 = vmul.f32 1.442695, %v523_v43  ;;  %v1255_v48 = vpop.eup %1254  ;;  %v614_v47 = vadd.f32 1.0, %v1253_v3  ;;  %1272 = vlog2.f32 %v611_v21  ;;  %v1133_v26 = vpack.c.bf16 %v1624_v16, %v1629_v52 }
 0x12c   :  { %v1257_v49 = vpop.eup %1256  ;;  %v660_v41 = vmul.f32 0.6931472, %v1255_v48  ;;  %v1868_v43 = vmax.f32 %v1433_v31, 0.0  ;;  %v630_v22 = vmul.f32 0.6931472, %v1564_v34  ;;  %v1869_v35 = vmax.f32 %v1535_v4, 0.0 }
 0x12d   :  { %1274 = vlog2.f32 %v614_v47  ;;  %v613_v33 = vadd.f32 1.0, %v1257_v49  ;;  %v1870_v25 = vmax.f32 %v1430_v28, 0.0  ;;  %v632_v38 = vmul.f32 0.6931472, %v1558_v45 }
 0x12e   :  { %v1666_v8 = vadd.f32 %v626_v30, %v1868_v43  ;;  %v1259_v3 = vpop.eup %1258  ;;  %1276 = vpow2.f32 %v583_v9  ;;  %v1671_v36 = vadd.f32 %v660_v41, %v1869_v35  ;;  %v1871_v48 = vmax.f32 %v1444_v42, 0.0 }
 0x12f   :  { %v1675_v19 = vadd.f32 %v628_v13, %v1870_v25  ;;  %v1678_v21 = vpop.eup %1260  ;;  %1278 = vlog2.f32 %v613_v33  ;;  %v616_v31 = vadd.f32 1.0, %v1259_v3  ;;  %v1137_v34 = vpack.c.bf16 %v1640_v1, %v1645_v12 }
 0x130   :  { %v1682_v47 = vadd.f32 %v630_v22, %v1871_v48  ;;  %v1263_v4 = vpop.eup %1262  ;;  %1280 = vpow2.f32 %v581_v59  ;;  %v1872_v28 = vpack.c.bf16 %v1461_v63, %v1464_v2  ;;  %v1873_v9 = vmax.f32 %v1441_v39, 0.0 }
 0x131   :  { %v1147_v45 = vpack.c.bf16 %v1675_v19, %v1666_v8  ;;  %v634_v42 = vmul.f32 0.6931472, %v1583_v44  ;;  %v1265_v49 = vpop.eup %1264  ;;  %1282 = vlog2.f32 %v616_v31  ;;  %v658_v41 = vmul.f32 0.6931472, %v1263_v4 }
 0x132   :  { %1128 = vmatpush3.bf16.xpose.msra.mxu0 %v1872_v28  ;;  %v1693_v30 = vadd.f32 %v632_v38, %v1873_v9  ;;  %v636_v13 = vmul.f32 0.6931472, %v1575_v57  ;;  %v638_v59 = vmul.f32 0.6931472, %v1598_v37  ;;  %v615_v33 = vadd.f32 1.0, %v1265_v49  ;;  %v1267_v3 = vpop.eup %1266 }
 0x133   :  { %1130 = vmatprep.subr.bf16.mxu0 %v1129_v17  ;;  %1284 = vpow2.f32 %v587_v18  ;;  %v1874_v22 = vmax.f32 %v1454_v54, 0.0  ;;  %v1875_v44 = vmax.f32 %v1547_v55, 0.0  ;;  %v1876_v17 = vmax.f32 %v1451_v51, 0.0  ;;  %v1269_v18 = vpop.eup %1268 }
 0x134   :  { %v1151_v43 = vpack.c.bf16 %v1693_v30, %v1682_v47  ;;  %1286 = vpow2.f32 %v585_v20  ;;  %v640_v37 = vmul.f32 0.6931472, %v1591_v6  ;;  %v664_v25 = vmul.f32 0.6931472, %v1267_v3  ;;  %v1271_v20 = vpop.eup %1270 }
 0x135   :  { %v1702_v39 = vadd.f32 %v634_v42, %v1874_v22  ;;  %v1706_v35 = vadd.f32 %v658_v41, %v1875_v44  ;;  %v1710_v57 = vadd.f32 %v636_v13, %v1876_v17  ;;  %1288 = vlog2.f32 %v615_v33  ;;  %v1273_v4 = vpop.eup %1272 }
 0x136   :  { %v1877_v38 = vmax.f32 %v1464_v2, 0.0  ;;  %v642_v31 = vmul.f32 0.6931472, %v1626_v32  ;;  %1290 = vlog2.f32 %v605_v24  ;;  %v662_v48 = vmul.f32 0.6931472, %v1269_v18 }
 0x137   :  { %v1145_v55 = vpack.c.bf16 %v1671_v36, %v1706_v35  ;;  %v1155_v51 = vpack.c.bf16 %v1710_v57, %v1702_v39  ;;  %1292 = vlog2.f32 %v606_v0  ;;  %v1878_v6 = vmax.f32 %v1553_v61, 0.0  ;;  %v1275_v32 = vpop.eup %1274 }
 0x138   :  { %v1715_v54 = vadd.f32 %v638_v59, %v1877_v38  ;;  %v668_v2 = vmul.f32 0.6931472, %v1271_v20  ;;  %v1879_v9 = vmax.f32 %v1461_v63, 0.0  ;;  %1294 = vlog2.f32 %v1517_v14  ;;  %v1277_v0 = vpop.eup %1276 }
 0x139   :  { %v1724_v28 = vadd.f32 %v664_v25, %v1878_v6  ;;  %v1880_v24 = vmax.f32 %v1556_v62, 0.0  ;;  %v666_v41 = vmul.f32 0.6931472, %v1273_v4  ;;  %v644_v13 = vmul.f32 0.6931472, %v1602_v29  ;;  %v1279_v3 = vpop.eup %1278 }
 0x13a   :  { %v1728_v42 = vadd.f32 %v640_v37, %v1879_v9  ;;  %v1881_v61 = vpack.c.bf16 %v1471_v11, %v1475_v15  ;;  %v1882_v59 = vmax.f32 %v1568_v5, 0.0  ;;  %v672_v33 = vmul.f32 0.6931472, %v1275_v32 }
 0x13b   :  { %v1733_v49 = vadd.f32 %v662_v48, %v1880_v24  ;;  %v1883_v62 = vmax.f32 %v1475_v15, 0.0  ;;  %v618_v44 = vadd.f32 1.0, %v1277_v0  ;;  %v1884_v5 = vmax.f32 %v1571_v27, 0.0  ;;  %v1281_v15 = vpop.eup %1280 }
 0x13c   :  { %1132 = vmatpush3.bf16.xpose.msra.mxu0 %v1881_v61  ;;  %v1741_v63 = vadd.f32 %v668_v2, %v1882_v59  ;;  %v1159_v14 = vpack.c.bf16 %v1728_v42, %v1715_v54  ;;  %v1885_v37 = vmax.f32 %v1471_v11, 0.0  ;;  %v670_v25 = vmul.f32 0.6931472, %v1279_v3  ;;  %v1283_v4 = vpop.eup %1282 }
 0x13d   :  { %v1747_v22 = vadd.f32 %v642_v31, %v1883_v62  ;;  %v1149_v29 = vpack.c.bf16 %v1724_v28, %v1733_v49  ;;  %1134 = vmatprep.subr.bf16.mxu0 %v1133_v26  ;;  %v1756_v17 = vadd.f32 %v666_v41, %v1884_v5  ;;  %v1886_v38 = vmax.f32 %v1589_v56, 0.0  ;;  %v1285_v6 = vpop.eup %1284 }
 0x13e   :  { %v1760_v18 = vadd.f32 %v644_v13, %v1885_v37  ;;  %v646_v20 = vmul.f32 0.6931472, %v1642_v60  ;;  %v648_v48 = vmul.f32 0.6931472, %v1633_v53  ;;  %1296 = vlog2.f32 %v618_v44  ;;  %v1287_v41 = vpop.eup %1286 }
 0x13f   :  { %v1764_v31 = vadd.f32 %v672_v33, %v1886_v38  ;;  %v617_v26 = vadd.f32 1.0, %v1281_v15  ;;  %v1153_v27 = vpack.c.bf16 %v1741_v63, %v1756_v17  ;;  %v1887_v2 = vmax.f32 %v1594_v50, 0.0  ;;  %v1289_v59 = vpop.eup %1288 }
 0x140   :  { %v1163_v11 = vpack.c.bf16 %v1760_v18, %v1747_v22  ;;  %v676_v56 = vmul.f32 0.6931472, %v1283_v4  ;;  %v1888_v32 = vmax.f32 %v1489_v46, 0.0  ;;  %v1889_v53 = vmax.f32 %v1486_v40, 0.0  ;;  %v1291_v5 = vpop.eup %1290 }
 0x141   :  { %v1774_v9 = vadd.f32 %v670_v25, %v1887_v2  ;;  %1298 = vlog2.f32 %v617_v26  ;;  %v620_v13 = vadd.f32 1.0, %v1285_v6  ;;  %v650_v0 = vmul.f32 0.6931472, %v1678_v21  ;;  %v1892_v21 = vld [vmem:[#allocation6_spill] sm:$0xff] }
 0x142   :  { %v1778_v60 = vadd.f32 %v646_v20, %v1888_v32  ;;  %v1782_v24 = vadd.f32 %v648_v48, %v1889_v53  ;;  %v652_v61 = vmul.f32 0.6931472, %v1647_v23  ;;  %v619_v50 = vadd.f32 1.0, %v1287_v41  ;;  %v1293_v20 = vpop.eup %1292  ;;  %v1894_v48 = vld [vmem:[#allocation3_spill] sm:$0xff]  ;;  %v1899_v41 = vld [vmem:[#allocation2_spill] sm:$0xff] }
 0x143   :  { %v1157_v33 = vpack.c.bf16 %v1764_v31, %v1774_v9  ;;  %v1890_v62 = vmax.f32 %v1605_v10, 0.0  ;;  %1300 = vlog2.f32 %v620_v13  ;;  %v674_v37 = vmul.f32 0.6931472, %v1289_v59  ;;  %v1895_v31 = vld [vmem:[#allocation8_spill] sm:$0xff]  ;;  %v1295_v2 = vpop.eup %1294  ;;  %v1897_v9 = vld [vmem:[#allocation7_spill] sm:$0xff]  ;;  %v1900_v59 = vld [vmem:[#allocation9_spill] sm:$0xff] }
 0x144   :  { %v1167_v44 = vpack.c.bf16 %v1782_v24, %v1778_v60  ;;  %v1891_v15 = vmax.f32 %v1514_v7, 0.0  ;;  %v1893_v38 = vmax.f32 %v1892_v21, 0.0  ;;  %v429_v4 = vmax.f32 %v1894_v48, 0.0 }
 0x145   :  { %v712_v3 = vadd.f32 %v676_v56, %v1890_v62  ;;  %1302 = vlog2.f32 %v619_v50  ;;  %v445_v26 = vmax.f32 %v1895_v31, 0.0  ;;  %v654_v10 = vmul.f32 0.6931472, %v1291_v5 }
 0x146   :  { %v699_v25 = vadd.f32 %v650_v0, %v1891_v15  ;;  %v700_v23 = vadd.f32 %v652_v61, %v1893_v38  ;;  %v1896_v6 = vpack.c.bf16 %v1486_v40, %v1489_v46  ;;  %v446_v56 = vmax.f32 %v1897_v9, 0.0 }
 0x147   :  { %v656_v32 = vmul.f32 0.6931472, %v1293_v20  ;;  %v1898_v60 = vmax.f32 %v1608_v58, 0.0  ;;  %v430_v13 = vmax.f32 %v1899_v41, 0.0  ;;  %v701_v0 = vadd.f32 %v654_v10, %v445_v26 }
 0x148   :  { %1136 = vmatpush3.bf16.xpose.msra.mxu0 %v1896_v6  ;;  %v1171_v24 = vpack.c.bf16 %v700_v23, %v699_v25  ;;  %v624_v61 = vmul.f32 0.6931472, %v1295_v2  ;;  %v685_v50 = vadd.f32 %v1900_v59, %v429_v4  ;;  %v1297_v5 = vpop.eup %1296  ;;  %v458_v38 = vmax.f32 %v1624_v16, 0.0 }
 0x149   :  { %1138 = vmatprep.subr.bf16.mxu0 %v1137_v34  ;;  %v711_v53 = vadd.f32 %v674_v37, %v1898_v60  ;;  %v702_v40 = vadd.f32 %v656_v32, %v446_v56  ;;  %v680_v48 = vmul.f32 0.6931472, %v1297_v5  ;;  %v457_v58 = vmax.f32 %v1629_v52, 0.0 }
 0x14a   :  { %v686_v62 = vadd.f32 %v624_v61, %v430_v13  ;;  %v1901_v37 = vpack.c.bf16 %v1892_v21, %v1514_v7  ;;  %v460_v16 = vmax.f32 %v1640_v1, 0.0  ;;  %v459_v10 = vmax.f32 %v1645_v12, 0.0  ;;  %v1902_v21 = vld [vmem:[#allocation4_spill] sm:$0xff]  ;;  %v1903_v1 = vld [vmem:[#allocation5_spill] sm:$0xff] }
 0x14b   :  { %v1161_v46 = vpack.c.bf16 %v712_v3, %v711_v53  ;;  %v1141_v15 = vpack.c.bf16 %v702_v40, %v701_v0  ;;  %v1299_v34 = vpop.eup %1298  ;;  %v714_v23 = vadd.f32 %v680_v48, %v458_v38  ;;  %v1304_v36 = vmov 1966171168  }
 0x14c   :  { %v1143_v20 = vpack.c.bf16 %v686_v62, %v685_v50  ;;  %v678_v25 = vmul.f32 0.6931472, %v1299_v34  ;;  %v865_v19 = vunpack.c.l.s4 %v1304_v36  ;;  %v867_v47 = vlaneseq }
 0x14d   :  { %1142 = vmatprep.subr.bf16.mxu1 %v1141_v15  ;;  %v1301_v4 = vpop.eup %1300 }
 0x14e   :  { %1144 = vmatpush3.bf16.xpose.msra.mxu1 %v1143_v20  ;;  %v713_v31 = vadd.f32 %v678_v25, %v457_v58  ;;  %v684_v26 = vmul.f32 0.6931472, %v1301_v4  ;;  %v868_v30 = vshrl.u32 %v867_v47, 7  ;;  %vm881_vm1 = vcmp.lt.s32.totalorder %v867_v47, 256 }
 0x14f   :  { %1146 = vmatprep.subr.bf16.mxu1 %v1145_v55  ;;  %v1303_v3 = vpop.eup %1302 }
 0x150   :  { %1140 = vmatpush3.bf16.xpose.msra.mxu0 %v1901_v37  ;;  %v682_v52 = vmul.f32 0.6931472, %v1303_v3  ;;  %v1165_v6 = vpack.c.bf16 %v714_v23, %v713_v31  ;;  %v716_v2 = vadd.f32 %v684_v26, %v460_v16 }
 0x152   :  { %v715_v9 = vadd.f32 %v682_v52, %v459_v10 }
 0x154   :  { %v1169_v7 = vpack.c.bf16 %v716_v2, %v715_v9 }
 0x156   :  { %1148 = vmatpush3.bf16.xpose.msra.mxu1 %v1147_v45  ;;  %v866_v45 = vunpack.c.0.s8 %v865_v19 }
 0x157   :  { %994 = vmatmul.mubr.f32.vlgmr.msra.gmra.mrb[32].mxu0 %v1902_v21  ;;  %1150 = vmatprep.subr.bf16.mxu1 %v1149_v29 }
 0x158   :  { %v869_v54 = vsub.s32 %v866_v45, %v868_v30 }
 0x15e   :  { %1152 = vmatpush3.bf16.xpose.msra.mxu1 %v1151_v43 }
 0x15f   :  { %1154 = vmatprep.subr.bf16.mxu1 %v1153_v27 }
 0x166   :  { %1156 = vmatpush3.bf16.xpose.msra.mxu1 %v1155_v51 }
 0x167   :  { %1158 = vmatprep.subr.bf16.mxu1 %v1157_v33 }
 0x16e   :  { %1160 = vmatpush3.bf16.xpose.msra.mxu1 %v1159_v14 }
 0x16f   :  { %1162 = vmatprep.subr.bf16.mxu1 %v1161_v46 }
 0x176   :  { %1164 = vmatpush3.bf16.xpose.msra.mxu1 %v1163_v11 }
 0x177   :  { %1166 = vmatprep.subr.bf16.mxu1 %v1165_v6 }
 0x17e   :  { %1168 = vmatpush3.bf16.xpose.msra.mxu1 %v1167_v44 }
 0x17f   :  { %1170 = vmatprep.subr.bf16.mxu1 %v1169_v7 }
 0x186   :  { %1172 = vmatpush3.bf16.xpose.msra.mxu1 %v1171_v24 }
 0x18d   :  { %1028 = vmatmul.mubr.f32.vlgmr.msra.gmra.mrb[0].mxu1 %v1903_v1 }
 0x22a   :  { %v785_v12 = vpop.f32.mrb[32].mxu0 }
 0x22b   :  { %v787_v8 = vpop.f32.mrb[33].mxu0 }
 0x260   :  { %v856_v43 = vpop.f32.mrb[0].mxu1 }
 0x261   :  { %v857_v39 = vadd.f32 %v856_v43, %v785_v12  ;;  %v858_v35 = vpop.f32.mrb[1].mxu1 }
 0x262   :  { %v859_v57 = vadd.f32 %v858_v35, %v787_v8 }
 0x264   :  { %v863_v55 = vcombine.low %v857_v39, %v859_v57 }
 0x266   :  { %v870_v51 = vrot.slane %v863_v55, %v869_v54 }
 0x268   :  { %v877_v28 = vrot.slane %v870_v51, %v869_v54 }
 0x26a   :  { %883 = vst.msk [vmem:[%s1850_s5] sm:$0x3] %vm881_vm1, %v877_v28 }

</bundles_post_ra>
